<compile_context>
chip_gen: v7x
topology: tpu7x:2x2x1
jax: 0.10.0
libtpu: 0.0.40
codegen_flags: <defaults>
</compile_context>

<pallas_src>
import functools

import jax
import jax.numpy as jnp
from jax.experimental import pallas as pl
from jax.experimental.pallas import tpu as pltpu


_LANE_CHOICES = (1024, 512, 256, 128)      # last-dim widths (multiples of 128 -> lane-dense)
_TARGET_TILE_BYTES = 4 * 1024 * 1024       # ~4 MiB per buffer (safe on v5e/v6e/v7x VMEM)
_MIN_PALLAS_ELEMS = 8192                   # one full (8, 1024) f32 tile
_MIN_GRID_STEPS = 8                        # aim for >= 8 steps so the pipeline overlaps


def _sublane_multiple(dtype) -> int:
    """Sublane packing multiple: 8 for 4-byte, 16 for 2-byte, 32 for 1-byte dtypes."""
    itemsize = jnp.dtype(dtype).itemsize
    return 32 // min(itemsize, 4)


def _int_pow(x, exponent: int):
    """x ** exponent via square-and-multiply (statically unrolled at trace time)."""
    if exponent == 0:
        return jnp.ones_like(x)
    neg = exponent < 0
    e = -exponent if neg else exponent
    result = None
    base = x
    while e > 0:  # static Python loop — unrolled at trace time
        if e & 1:
            result = base if result is None else result * base
        e >>= 1
        if e:
            base = base * base
    if neg:
        # Exact divide: full f32 accuracy and 0 ** (-n) -> inf (matches torch).
        # Integer exponents wrap at native width for integer inputs (torch semantics).
        result = 1.0 / result
    return result


def _pow_kernel(x_ref, o_ref, *, exponent: int):
    x = x_ref[...]
    # Compute in f32 for sub-32-bit float inputs: avoids compounding rounding
    # error across log2(exponent) multiplies; casts are free in a mem-bound kernel.
    if jnp.issubdtype(x_ref.dtype, jnp.floating) and jnp.dtype(x_ref.dtype).itemsize < 4:
        x = x.astype(jnp.float32)
    o_ref[...] = _int_pow(x, exponent).astype(o_ref.dtype)


def _pick_tile_rows(rows: int, lanes: int, itemsize: int, sublane: int) -> int:
    """Row-tile size: byte budget, sublane-aligned, and >= _MIN_GRID_STEPS steps if possible."""
    if rows <= sublane:
        return rows  # single block equal to the full row extent (always legal)
    budget = max(sublane, (_TARGET_TILE_BYTES // (lanes * itemsize)) // sublane * sublane)
    overlap = max(sublane, (rows // _MIN_GRID_STEPS) // sublane * sublane)
    return min(budget, overlap)


def pallas_pow(x: jax.Array, exponent: int) -> jax.Array:
    """Elementwise x.pow(exponent) for a static integer exponent (PyTorch `Pow`)."""
    exponent = int(exponent)

    if exponent < 0 and not jnp.issubdtype(x.dtype, jnp.floating):
        raise ValueError(
            "Negative integer exponents are only supported for floating-point "
            "inputs (matches PyTorch semantics)."
        )
    if exponent == 0:
        return jnp.ones_like(x)   # write-only: never read x from HBM
    if exponent == 1:
        return x                  # no kernel launch needed

    n = x.size
    if n < _MIN_PALLAS_ELEMS or n % 128 != 0:
        # Tiny tensors (the module's own (4, 4) case) or ragged sizes: a fused
        # XLA elementwise op moves fewer bytes than pad + kernel + slice would.
        return jnp.power(x, exponent).astype(x.dtype)

    lanes = next(l for l in _LANE_CHOICES if n % l == 0)
    rows = n // lanes
    itemsize = jnp.dtype(x.dtype).itemsize
    sublane = _sublane_multiple(x.dtype)

    x2d = x.reshape(rows, lanes)  # contiguous reshape: no HBM traffic

    tile_rows = _pick_tile_rows(rows, lanes, itemsize, sublane)
    grid = (pl.cdiv(rows, tile_rows),)

    kernel = functools.partial(_pow_kernel, exponent=exponent)
    out2d = pl.pallas_call(
        kernel,
        out_shape=jax.ShapeDtypeStruct((rows, lanes), x.dtype),
        grid=grid,
        in_specs=[pl.BlockSpec((tile_rows, lanes), lambda i: (i, 0))],
        out_specs=pl.BlockSpec((tile_rows, lanes), lambda i: (i, 0)),
        compiler_params=pltpu.CompilerParams(
            dimension_semantics=("parallel",),   # shard grid across v7x's 2 TCs
            vmem_limit_bytes=32 * 1024 * 1024,
        ),
    )(x2d)

    return out2d.reshape(x.shape)


if __name__ == "__main__":
    key = jax.random.PRNGKey(0)
    k1, k2, k3, k4, k5 = jax.random.split(key, 5)

    # 1) Spec case: torch.rand(4, 4), exponent=2 ("basic squaring").
    #    Tiny -> wrapper fast path (no Pallas launch).
    x_spec = jax.random.uniform(k1, (4, 4), dtype=jnp.float32)
    y_spec = pallas_pow(x_spec, 2)
    jax.block_until_ready(y_spec)
    assert jnp.allclose(y_spec, x_spec * x_spec, rtol=1e-5, atol=1e-6)

    # 2) Small 4-D tensor (2048 elems): below one tile -> XLA fast path.
    x_nchw = jax.random.uniform(k2, (2, 4, 16, 16), dtype=jnp.float32)
    y_nchw = pallas_pow(x_nchw, 2)
    jax.block_until_ready(y_nchw)
    assert y_nchw.shape == x_nchw.shape
    assert jnp.allclose(y_nchw, x_nchw * x_nchw, rtol=1e-6, atol=1e-7)

    # 3) Pallas path, exponent=3: (64, 256) -> lanes=1024, rows=16, 2 grid steps.
    x_big = jax.random.uniform(k3, (64, 256), dtype=jnp.float32)
    y_big = pallas_pow(x_big, 3)
    jax.block_until_ready(y_big)
    assert jnp.allclose(y_big, x_big * x_big * x_big, rtol=1e-6, atol=1e-7)

    # 4) Negative exponent (exact divide after square-and-multiply).
    x_neg = 0.5 + jax.random.uniform(k4, (64, 512), dtype=jnp.float32)
    y_neg = pallas_pow(x_neg, -2)
    jax.block_until_ready(y_neg)
    assert jnp.allclose(y_neg, 1.0 / (x_neg * x_neg), rtol=1e-5, atol=1e-6)

    # 5) bf16 input with f32 intermediate accumulation (dtype-aware sublane tiling).
    x_bf16 = jax.random.uniform(k5, (32, 1024), dtype=jnp.float32).astype(jnp.bfloat16)
    y_bf16 = pallas_pow(x_bf16, 4)
    jax.block_until_ready(y_bf16)
    ref_bf16 = jnp.power(x_bf16.astype(jnp.float32), 4).astype(jnp.bfloat16)
    assert jnp.allclose(
        y_bf16.astype(jnp.float32), ref_bf16.astype(jnp.float32), rtol=2e-2, atol=1e-3
    )

    print("KERNEL_OK")
</pallas_src>

<mosaic_0001>
module attributes {stable_mosaic.version = 11 : i64} {
  func.func @_pow_kernel(%arg0: i32, %arg1: memref<8x1024xf32, #tpu.memory_space<vmem>>, %arg2: memref<8x1024xf32, #tpu.memory_space<vmem>>) attributes {dimension_semantics = [#tpu.dimension_semantics<parallel>], iteration_bounds = array<i64: 2>, scalar_prefetch = 0 : i64, scratch_operands = 0 : i64, tpu.core_type = #tpu.core_type<tc>, window_params = [{transform_indices = @transform_0, window_bounds = array<i64: 8, 1024>}, {transform_indices = @transform_1, window_bounds = array<i64: 8, 1024>}]} {
    %c0 = arith.constant 0 : index
    %c0_0 = arith.constant 0 : index
    %0 = vector.load %arg1[%c0, %c0_0] : memref<8x1024xf32, #tpu.memory_space<vmem>>, vector<8x1024xf32>
    %1 = arith.mulf %0, %0 : vector<8x1024xf32>
    %2 = arith.mulf %0, %1 : vector<8x1024xf32>
    %c0_1 = arith.constant 0 : index
    %c0_2 = arith.constant 0 : index
    %3 = vector.load %arg2[%c0_1, %c0_2] : memref<8x1024xf32, #tpu.memory_space<vmem>>, vector<8x1024xf32>
    tpu.vector_store %arg2[%c0_1, %c0_2], %2 {strides = array<i32>} : memref<8x1024xf32, #tpu.memory_space<vmem>>, vector<8x1024xf32>,
    return
  }
  func.func @transform_0(%arg0: i32) -> (i32, i32) {
    %c0_i32 = arith.constant 0 : i32
    %c0_i32_0 = arith.constant 0 : i32
    return %arg0, %c0_i32 : i32, i32
  }
  func.func @transform_1(%arg0: i32) -> (i32, i32) {
    %c0_i32 = arith.constant 0 : i32
    %c0_i32_0 = arith.constant 0 : i32
    return %arg0, %c0_i32 : i32, i32
  }
}

</mosaic_0001>

<bundles_post_ra>
// kernel: tpu_custom_call.1
= control target key start
LH: loop header
LB: loop body
LE: loop exit
PB: predicated region body
PF: predicated region fallthrough
CT: control target
= control target key end

     0   :  { %6 = vsyncpa [#allocation3], 0  ;;  %s583_s0 = inlined_call_operand.hbm [shape: f32[16,1024], index: 0, kind: input, shape index: {}]   ;;  %s584_s1 = inlined_call_operand.hbm [shape: f32[16,1024], index: 1, kind: output, shape index: {}]  }
   0x1   :  { %8 = vsyncpa [#allocation3 + $0x1], 0 }
   0x2   :  { %9 = vsyncpa [#allocation4], 0 }
   0x3   :  { %11 = vsyncpa [#allocation4 + $0x1], 0  ;;  %s422_s6 = smov 0   ;;  %s424_s7 = smov 0  }
   0x4   :  { %s426_s8 = smov 0   ;;  %s428_s9 = smov 0  }
   0x5 LB: > { %s443_s10 = sadd.s32 4294967295, %s408_s9   ;;  %s250_s11 = sadd.s32 4294967294, %s408_s9   ;;  %s408_s9 = sphi %s428_s9, %s599_s9   ;;  %s404_s8 = sphi %s426_s8, %s598_s8   ;;  %s400_s7 = sphi %s424_s7, %s597_s7   ;;  %s396_s6 = sphi %s422_s6, %s596_s6  }
   0x6   : > { %s447_s12 = sadd.s32 1, %s408_s9   ;;  %s24_s13 = sadd.s32 1, %s404_s8 }
   0x7   : > { %s21_s14 = ssub.s32 %s408_s9, %s447_s12  ;;  %p31_p0 = scmp.ne.s32.totalorder %s404_s8, %s400_s7 }
   0x8   : > { %p22_p1 = scmp.eq.s32.totalorder %s21_s14, 0  ;;  %p32_p2 = scmp.eq.s32.totalorder %s408_s9, 0 }
   0x9   : > { %p37_p3 = scmp.ne.s32.totalorder %s400_s7, %s396_s6  ;;  %p38_p4 = scmp.eq.s32.totalorder %s443_s10, 0 }
   0xa   : > { %s459_s15 = scalar_select %p22_p1, %s404_s8, %s24_s13  }
   0xb   : > { %p461_p5 = por %p32_p2, %p31_p0  ;;  %p465_p6 = por %p38_p4, %p37_p3 }
   0xc   : > { %p61_p7 = scmp.eq.s32.totalorder %s443_s10, 1  ;;  %p67_p8 = scmp.eq.s32.totalorder %s250_s11, 1 }
   0xd   : > { %p278_p10 = scmp.lt.s32.totalorder %s408_s9, 2  ;;  %s87_s20 = sand.u32 1, %s404_s8  }
   0xe   : > { %p472_p11 = por %p61_p7, %p31_p0  ;;  %p476_p12 = por %p67_p8, %p37_p3 }
   0xf   : > { %s264_s21 = sshll.u32 %s408_s9, 10  ;;  %s253_s22 = sshll.u32 %s87_s20, 6 }
  0x10   : > { %s588_s18 = scalar_select %p472_p11, 1, 0 }
  0x11   : > { %s589_s19 = scalar_select %p476_p12, 1, 0 }
  0x12   : > { %s485_s25 = scalar_lea.hbm %s583_s0, %s264_s21  ;;  %s91_s26 = scalar_lea.vmem [#allocation2], %s253_s22 }
  0x13   : > { %s99_s27 = sshll.u32 %s91_s26, 4  ;;  %p489_p13 = pnand %p278_p10, %p461_p5  ;;  %s493_s27 = int_to_ptr.vmem [resolvable:$true] %s99_s27 }
  0x14   : > { %s88_s29 = scalar_lea.sflag [#allocation3], %s87_s20  ;;  %s312_s30 = scalar_lea.hbm %s485_s25, 1024 }
  0x15   : > { %p313_p2 = scmp.ne.s32.totalorder %s485_s25, %s312_s30  ;;  %p314_p3 = pneg %p489_p13 }
  0x16   : > { %s317_s4 = scalar_lea.hbm %s583_s0, 2048  ;;  %p318_p5 = scmp.lt.u32.totalorder %s485_s25, %s583_s0 }
  0x17   : > { %p315_p4 = pnand %p314_p3, %p313_p2  ;;  %p319_p8 = scmp.lt.u32.totalorder %s317_s4, %s312_s30 }
  0x18   : > { %p321_p9 = scmp.lt.u32.totalorder %s312_s30, %s485_s25 }
  0x19   : > { %p316_p7 = pneg %p315_p4  ;;  %p320_p10 = por %p319_p8, %p318_p5 }
  0x1b   : > { %p322_p0 = por %p321_p9, %p320_p10 }
  0x1d   : > { %p323_p1 = pnand %p322_p0, %p316_p7 }
  0x1f   : > { %326 = shalt.err (!%p323_p1)
}
  0x20   : > { %s327_s13 = scalar_lea.vmem %s493_s27, 1024  ;;  %s410_s14 = smov [#allocation2]  }
  0x21   : > { %p328_p2 = scmp.ne.s32.totalorder %s493_s27, %s327_s13  ;;  %s332_s16 = sshll.u32 %s410_s14, 4  ;;  %s333_s16 = int_to_ptr.vmem [resolvable:$false] %s332_s16 }
  0x22   : > { %s334_s20 = scalar_lea.vmem %s333_s16, 2048  ;;  %p335_p11 = scmp.lt.s32.totalorder %s493_s27, %s333_s16 }
  0x23   : > { %p330_p4 = pnand %p328_p2, %p314_p3  ;;  %p336_p5 = scmp.lt.s32.totalorder %s334_s20, %s327_s13 }
  0x25   : > { %p331_p12 = pneg %p330_p4  ;;  %p337_p8 = por %p336_p5, %p335_p11 }
  0x27   : > { %p338_p9 = pnand %p337_p8, %p331_p12 }
  0x29   : > { %341 = shalt.err (!%p338_p9)
}
  0x2a   : > { %273 = dma.hbm_to_vmem [thread:$0]  (!%p489_p13), %s485_s25, 1024, %s493_s27, %s88_s29  }
  0x2b   : > { %p591_p0 = scmp.lt.s32.totalorder %s408_s9, 3  ;;  %p592_p1 = scmp.ge.s32.totalorder %s408_s9, 1 }
  0x2d   : > { %p105_p3 = pnand %p592_p1, %p591_p0 }
  0x2e   : > { %s527_s21 = sand.u32 (!%p105_p3), 1, %s400_s7  }
  0x2f   : > { %108 = sbr.rel (%p105_p3) target bundleno = 81 (0x51), region = 24  ;;  %s257_s22 = sshll.u32 (!%p105_p3), %s527_s21, 6 }
  0x30   : > { %s111_s23 = scalar_lea.sflag (!%p105_p3), [#allocation3], %s527_s21  ;;  %s114_s24 = scalar_lea.vmem (!%p105_p3), [#allocation2], %s257_s22 }
  0x36   : > { %387 = dma.done.wait (%p465_p6), %s111_s23, 1024  }
  0x37   : > { %389 = vsyncadd (%p465_p6), %s111_s23, 4294966272  ;;  %v133_v0 = vld [vmem:[%s114_s24] sm:$0xff]  ;;  %v134_v1 = vld [vmem:[%s114_s24 + $0x8] sm:$0xff]  ;;  %s265_s17 = sshll.u32 %s443_s10, 10  ;;  %s132_s25 = scalar_lea.vmem [#allocation5], %s257_s22 }
  0x38   : > { %v135_v2 = vld [vmem:[%s114_s24 + $0x10] sm:$0xff]  ;;  %v141_v3 = vmul.f32 %v133_v0, %v133_v0  ;;  %v142_v4 = vmul.f32 %v134_v1, %v134_v1  ;;  %v136_v6 = vld [vmem:[%s114_s24 + $0x18] sm:$0xff]  ;;  %v137_v7 = vld [vmem:[%s114_s24 + $0x20] sm:$0xff]  ;;  %s180_s26 = sshll.u32 %s132_s25, 4  ;;  %s539_s10 = scalar_lea.hbm %s584_s1, %s265_s17  ;;  %s541_s26 = int_to_ptr.vmem [resolvable:$true] %s180_s26 }
  0x39   : > { %v143_v5 = vmul.f32 %v135_v2, %v135_v2  ;;  %v138_v8 = vld [vmem:[%s114_s24 + $0x28] sm:$0xff]  ;;  %v144_v9 = vmul.f32 %v136_v6, %v136_v6  ;;  %v145_v10 = vmul.f32 %v137_v7, %v137_v7  ;;  %v139_v12 = vld [vmem:[%s114_s24 + $0x30] sm:$0xff]  ;;  %v140_v13 = vld [vmem:[%s114_s24 + $0x38] sm:$0xff]  ;;  %s166_s29 = scalar_lea.sflag [#allocation4], %s527_s21  ;;  %s342_s30 = scalar_lea.vmem %s541_s26, 1024 }
  0x3a   : > { %v146_v11 = vmul.f32 %v138_v8, %v138_v8  ;;  %v149_v14 = vmul.f32 %v141_v3, %v133_v0  ;;  %v150_v15 = vmul.f32 %v142_v4, %v134_v1  ;;  %v147_v17 = vmul.f32 %v139_v12, %v139_v12  ;;  %p343_p6 = scmp.ne.s32.totalorder %s541_s26, %s342_s30  ;;  %p593_p11 = scmp.ne.s32.totalorder %s588_s18, 0 }
  0x3b   : > { %v151_v16 = vmul.f32 %v143_v5, %v135_v2  ;;  %v152_v18 = vmul.f32 %v144_v9, %v136_v6  ;;  %v153_v19 = vmul.f32 %v145_v10, %v137_v7  ;;  %v148_v21 = vmul.f32 %v140_v13, %v140_v13  ;;  %s411_s2 = smov [#allocation5]  }
  0x3c   : > { %v154_v20 = vmul.f32 %v146_v11, %v138_v8  ;;  %157 = vst [vmem:[%s132_s25] sm:$0xff] %v149_v14  ;;  %158 = vst [vmem:[%s132_s25 + $0x8] sm:$0xff] %v150_v15  ;;  %v155_v22 = vmul.f32 %v147_v17, %v139_v12  ;;  %p344_p12 = pnand %p343_p6, %p593_p11  ;;  %s346_s3 = sshll.u32 %s411_s2, 4  ;;  %s347_s3 = int_to_ptr.vmem [resolvable:$false] %s346_s3 }
  0x3d   : > { %159 = vst [vmem:[%s132_s25 + $0x10] sm:$0xff] %v151_v16  ;;  %160 = vst [vmem:[%s132_s25 + $0x18] sm:$0xff] %v152_v18  ;;  %v156_v23 = vmul.f32 %v148_v21, %v140_v13  ;;  %s348_s4 = scalar_lea.vmem %s347_s3, 2048  ;;  %p349_p7 = scmp.lt.s32.totalorder %s541_s26, %s347_s3 }
  0x3e   : > { %161 = vst [vmem:[%s132_s25 + $0x20] sm:$0xff] %v153_v19  ;;  %162 = vst [vmem:[%s132_s25 + $0x28] sm:$0xff] %v154_v20  ;;  %p345_p13 = pneg %p344_p12  ;;  %p350_p10 = scmp.lt.s32.totalorder %s348_s4, %s342_s30 }
  0x3f   : > { %163 = vst [vmem:[%s132_s25 + $0x30] sm:$0xff] %v155_v22  ;;  %164 = vst [vmem:[%s132_s25 + $0x38] sm:$0xff] %v156_v23 }
  0x40   : > { %p351_p2 = por %p350_p10, %p349_p7 }
  0x42   : > { %p352_p4 = pnand %p351_p2, %p345_p13 }
  0x44   : > { %355 = shalt.err (!%p352_p4)
}
  0x45   : > { %s356_s5 = scalar_lea.hbm %s539_s10, 1024  ;;  %s360_s14 = scalar_lea.hbm %s584_s1, 2048 }
  0x46   : > { %p357_p5 = scmp.ne.s32.totalorder %s539_s10, %s356_s5  ;;  %p361_p0 = scmp.lt.u32.totalorder %s539_s10, %s584_s1 }
  0x47   : > { %p362_p1 = scmp.lt.u32.totalorder %s360_s14, %s356_s5  ;;  %p364_p6 = scmp.lt.u32.totalorder %s356_s5, %s539_s10 }
  0x48   : > { %p358_p8 = pnand %p357_p5, %p593_p11 }
  0x49   : > { %p363_p3 = por %p362_p1, %p361_p0 }
  0x4a   : > { %p359_p9 = pneg %p358_p8 }
  0x4b   : > { %p365_p12 = por %p364_p6, %p363_p3 }
  0x4d   : > { %p366_p13 = pnand %p365_p12, %p359_p9 }
  0x4f   : > { %369 = shalt.err (!%p366_p13)
}
  0x50   : > { %268 = dma.vmem_to_hbm [thread:$0]  (%p593_p11), %s541_s26, 1024, %s539_s10, %s166_s29  }
  0x51 PF: > { %s192_s21 = sand.u32 1, %s396_s6   ;;  %p594_p7 = scmp.ne.s32.totalorder %s589_s19, 0 }
  0x52   : > { %p595_p10 = scmp.ge.s32.totalorder %s408_s9, 2  ;;  %s193_s22 = scalar_lea.sflag [#allocation4], %s192_s21 }
  0x54   : > { %p275_p2 = pnand %p595_p10, %p594_p7 }
  0x56   : > { %391 = dma.done.wait (!%p275_p2), %s193_s22, 1024  }
  0x57   : > { %393 = vsyncadd (!%p275_p2), %s193_s22, 4294966272  ;;  %p14_p4 = scmp.ge.s32.totalorder %s447_s12, 4   ;;  %s596_s6 = smov %s400_s7 }
  0x58   : > { %s597_s7 = smov %s404_s8  ;;  %s598_s8 = smov %s459_s15 }
  0x59   : > { %s599_s9 = smov %s447_s12  ;;  %16 = sbr.rel (!%p14_p4) target bundleno = 5 (0x5), region = 69 }
  0x60   :  { %198 = vsyncpa [#allocation3], 1 }
  0x61   :  { %200 = vsyncpa [#allocation3 + $0x1], 1 }
  0x62   :  { %201 = vsyncpa [#allocation4], 1 }
  0x63   :  { %203 = vsyncpa [#allocation4 + $0x1], 1 }

</bundles_post_ra>
